<compile_context>
chip_gen: v5e
topology: v5e:2x2
jax: 0.10.0
libtpu: 0.0.40
codegen_flags: <defaults>
</compile_context>

<pallas_src>
import jax
import jax.numpy as jnp
from jax.experimental import pallas as pl
from jax.experimental.pallas import tpu as pltpu

EPS = 1e-5
USE_RELU = True


def bn_relu_kernel(x_ref, gamma_ref, beta_ref, o_ref):
    n = x_ref.shape[0]
    inv_n = jnp.float32(1.0 / n)

    # Two-pass batch statistics in f32 (matches PyTorch training-mode BN more
    # tightly than the one-pass E[x^2]-E[x]^2 form when |mean| >> std).
    x32 = x_ref[...].astype(jnp.float32)                    # (N, Ct)
    mean = jnp.sum(x32, axis=0, keepdims=True) * inv_n      # (1, Ct)
    d = x32 - mean
    var = jnp.sum(d * d, axis=0, keepdims=True) * inv_n     # biased (training)

    inv = jax.lax.rsqrt(var + EPS)                           # (1, Ct) on EUP
    scale = inv * gamma_ref[...].astype(jnp.float32)         # fold gamma
    shift = beta_ref[...].astype(jnp.float32) - mean * scale

    # Normalize + ReLU.  Re-read x_ref so the stats-phase f32 copy of
    # low-precision inputs is not kept live through the elementwise pass.
    y = x_ref[...].astype(jnp.float32) * scale + shift
    if USE_RELU:
        y = jnp.maximum(y, 0.0)
    o_ref[...] = y.astype(o_ref.dtype)


def _round_down_128(v):
    return (v // 128) * 128


def _round_up_128(v):
    return -(-v // 128) * 128


def _pick_c_tile(N, C, itemsize, target_bytes=4 << 20, vmem_budget=40 << 20):
    """Channel tile: multiple of 128 lanes, ~4 MiB per x buffer, VMEM-safe,
    and >=2 grid steps when C > 128 (so both v7x TensorCores get work)."""
    if C <= 128:
        return C  # block == full array extent is always legal
    # Per-element bytes: 2x input + 2x output double buffers plus roughly
    # three tile-sized f32 in-kernel temporaries.
    bytes_per_elem = 4 * itemsize + 3 * 4
    lanes = _round_down_128(target_bytes // max(1, N * itemsize))
    lanes_fit = _round_down_128(vmem_budget // max(1, N * bytes_per_elem))
    lanes = min(lanes, lanes_fit)
    # Guarantee >=2 grid steps for the "parallel" axis (v7x megacore).
    lanes = min(lanes, _round_up_128(pl.cdiv(C, 2)))
    # TODO(synk): for N so large that even a 128-lane tile exceeds the VMEM
    # budget, switch to a two-pass N-tiled scheme (accumulate sum/sumsq over
    # an "arbitrary" N grid, then normalize) instead of flooring here.
    lanes = max(128, lanes)
    return int(min(lanes, C))


def conv_reg_forward(x, gamma, beta, c_tile=None):
    """x: (N, C).  gamma, beta: (C,).  Returns relu(batchnorm(x)) in x.dtype."""
    N, C = x.shape
    itemsize = jnp.dtype(x.dtype).itemsize
    if c_tile is None:
        c_tile = _pick_c_tile(N, C, itemsize)
    grid = (pl.cdiv(C, c_tile),)

    gamma2d = gamma.reshape(1, C).astype(jnp.float32)
    beta2d = beta.reshape(1, C).astype(jnp.float32)

    cost = pl.CostEstimate(
        flops=8 * N * C,
        transcendentals=C,
        bytes_accessed=2 * N * C * itemsize + 2 * C * 4,
    )

    return pl.pallas_call(
        bn_relu_kernel,
        out_shape=jax.ShapeDtypeStruct((N, C), x.dtype),
        grid=grid,
        in_specs=[
            pl.BlockSpec((N, c_tile), lambda j: (0, j)),
            pl.BlockSpec((1, c_tile), lambda j: (0, j)),
            pl.BlockSpec((1, c_tile), lambda j: (0, j)),
        ],
        out_specs=pl.BlockSpec((N, c_tile), lambda j: (0, j)),
        compiler_params=pltpu.CompilerParams(
            dimension_semantics=("parallel",),
            vmem_limit_bytes=48 << 20,
        ),
        cost_estimate=cost,
    )(x, gamma2d, beta2d)


def _reference(x, gamma, beta):
    x32 = x.astype(jnp.float32)
    mean = jnp.mean(x32, axis=0, keepdims=True)
    var = jnp.mean((x32 - mean) ** 2, axis=0, keepdims=True)  # biased
    y = (x32 - mean) * jax.lax.rsqrt(var + EPS) * gamma + beta
    if USE_RELU:
        y = jnp.maximum(y, 0.0)
    return y.astype(x.dtype)


if __name__ == "__main__":
    # ---- Small shape matching the module spec: s_shape = t_shape = (N, C) ----
    N, C = 8, 32
    x = jax.random.normal(jax.random.PRNGKey(0), (N, C), dtype=jnp.float32)
    gamma = jnp.ones((C,), dtype=jnp.float32)   # fresh BatchNorm1d init
    beta = jnp.zeros((C,), dtype=jnp.float32)

    out = jax.block_until_ready(conv_reg_forward(x, gamma, beta))
    ref = _reference(x, gamma, beta)
    assert jnp.allclose(out, ref, atol=1e-5, rtol=1e-5), "mismatch (small)"

    # ---- Forced 128-lane tiles -> 3-step channel grid ----
    N2, C2 = 16, 384
    x2 = jax.random.normal(jax.random.PRNGKey(0), (N2, C2), dtype=jnp.float32) * 2.0 + 0.5
    gamma2 = jnp.ones((C2,), dtype=jnp.float32)
    beta2 = jnp.zeros((C2,), dtype=jnp.float32)
    out2 = jax.block_until_ready(conv_reg_forward(x2, gamma2, beta2, c_tile=128))
    assert jnp.allclose(out2, _reference(x2, gamma2, beta2), atol=1e-5, rtol=1e-5), \
        "mismatch (tiled)"

    # ---- Auto tile selection with the >=2-step megacore cap (C=1024 -> 512) ----
    N3, C3 = 64, 1024
    x3 = jax.random.normal(jax.random.PRNGKey(0), (N3, C3), dtype=jnp.float32) - 0.25
    gamma3 = jnp.ones((C3,), dtype=jnp.float32)
    beta3 = jnp.zeros((C3,), dtype=jnp.float32)
    out3 = jax.block_until_ready(conv_reg_forward(x3, gamma3, beta3))
    assert jnp.allclose(out3, _reference(x3, gamma3, beta3), atol=1e-5, rtol=1e-5), \
        "mismatch (auto tile)"

    print("KERNEL_OK")
</pallas_src>

<mosaic_0001>
module attributes {stable_mosaic.version = 11 : i64} {
  func.func @bn_relu_kernel(%arg0: i32, %arg1: memref<8x32xf32, #tpu.memory_space<vmem>>, %arg2: memref<1x32xf32, #tpu.memory_space<vmem>>, %arg3: memref<1x32xf32, #tpu.memory_space<vmem>>, %arg4: memref<8x32xf32, #tpu.memory_space<vmem>>) attributes {dimension_semantics = [#tpu.dimension_semantics<parallel>], iteration_bounds = array<i64: 1>, scalar_prefetch = 0 : i64, scratch_operands = 0 : i64, tpu.core_type = #tpu.core_type<tc>, window_params = [{transform_indices = @transform_0, window_bounds = array<i64: 8, 32>}, {transform_indices = @transform_1, window_bounds = array<i64: 1, 32>}, {transform_indices = @transform_2, window_bounds = array<i64: 1, 32>}, {transform_indices = @transform_3, window_bounds = array<i64: 8, 32>}]} {
    %c0 = arith.constant 0 : index
    %c0_0 = arith.constant 0 : index
    %0 = vector.load %arg1[%c0, %c0_0] : memref<8x32xf32, #tpu.memory_space<vmem>>, vector<8x32xf32>
    %cst = arith.constant dense<0.000000e+00> : vector<32xf32>
    %1 = vector.multi_reduction <add>, %0, %cst [0] : vector<8x32xf32> to vector<32xf32>
    %2 = vector.shape_cast %1 : vector<32xf32> to vector<1x32xf32>
    %cst_1 = arith.constant 1.250000e-01 : f32
    %3 = vector.broadcast %cst_1 : f32 to vector<1x32xf32>
    %4 = arith.mulf %2, %3 : vector<1x32xf32>
    %5 = vector.broadcast %4 : vector<1x32xf32> to vector<8x32xf32>
    %6 = arith.subf %0, %5 : vector<8x32xf32>
    %7 = arith.mulf %6, %6 : vector<8x32xf32>
    %cst_2 = arith.constant dense<0.000000e+00> : vector<32xf32>
    %8 = vector.multi_reduction <add>, %7, %cst_2 [0] : vector<8x32xf32> to vector<32xf32>
    %9 = vector.shape_cast %8 : vector<32xf32> to vector<1x32xf32>
    %cst_3 = arith.constant 1.250000e-01 : f32
    %10 = vector.broadcast %cst_3 : f32 to vector<1x32xf32>
    %11 = arith.mulf %9, %10 : vector<1x32xf32>
    %cst_4 = arith.constant 9.99999974E-6 : f32
    %12 = vector.broadcast %cst_4 : f32 to vector<1x32xf32>
    %13 = arith.addf %11, %12 : vector<1x32xf32>
    %14 = math.rsqrt %13 : vector<1x32xf32>
    %c0_5 = arith.constant 0 : index
    %c0_6 = arith.constant 0 : index
    %15 = vector.load %arg2[%c0_5, %c0_6] : memref<1x32xf32, #tpu.memory_space<vmem>>, vector<1x32xf32>
    %16 = arith.mulf %14, %15 : vector<1x32xf32>
    %c0_7 = arith.constant 0 : index
    %c0_8 = arith.constant 0 : index
    %17 = vector.load %arg3[%c0_7, %c0_8] : memref<1x32xf32, #tpu.memory_space<vmem>>, vector<1x32xf32>
    %18 = arith.mulf %4, %16 : vector<1x32xf32>
    %19 = arith.subf %17, %18 : vector<1x32xf32>
    %c0_9 = arith.constant 0 : index
    %c0_10 = arith.constant 0 : index
    %20 = vector.load %arg1[%c0_9, %c0_10] : memref<8x32xf32, #tpu.memory_space<vmem>>, vector<8x32xf32>
    %21 = vector.broadcast %16 : vector<1x32xf32> to vector<8x32xf32>
    %22 = arith.mulf %20, %21 : vector<8x32xf32>
    %23 = vector.broadcast %19 : vector<1x32xf32> to vector<8x32xf32>
    %24 = arith.addf %22, %23 : vector<8x32xf32>
    %cst_11 = arith.constant 0.000000e+00 : f32
    %25 = vector.broadcast %cst_11 : f32 to vector<8x32xf32>
    %26 = arith.maximumf %24, %25 : vector<8x32xf32>
    %c0_12 = arith.constant 0 : index
    %c0_13 = arith.constant 0 : index
    %27 = vector.load %arg4[%c0_12, %c0_13] : memref<8x32xf32, #tpu.memory_space<vmem>>, vector<8x32xf32>
    tpu.vector_store %arg4[%c0_12, %c0_13], %26 {strides = array<i32>} : memref<8x32xf32, #tpu.memory_space<vmem>>, vector<8x32xf32>,
    return
  }
  func.func @transform_0(%arg0: i32) -> (i32, i32) {
    %c0_i32 = arith.constant 0 : i32
    %c0_i32_0 = arith.constant 0 : i32
    return %c0_i32, %arg0 : i32, i32
  }
  func.func @transform_1(%arg0: i32) -> (i32, i32) {
    %c0_i32 = arith.constant 0 : i32
    %c0_i32_0 = arith.constant 0 : i32
    return %c0_i32, %arg0 : i32, i32
  }
  func.func @transform_2(%arg0: i32) -> (i32, i32) {
    %c0_i32 = arith.constant 0 : i32
    %c0_i32_0 = arith.constant 0 : i32
    return %c0_i32, %arg0 : i32, i32
  }
  func.func @transform_3(%arg0: i32) -> (i32, i32) {
    %c0_i32 = arith.constant 0 : i32
    %c0_i32_0 = arith.constant 0 : i32
    return %c0_i32, %arg0 : i32, i32
  }
}

</mosaic_0001>

<bundles_post_ra>
// kernel: tpu_custom_call.1
= control target key start
LH: loop header
LB: loop body
LE: loop exit
PB: predicated region body
PF: predicated region fallthrough
CT: control target
= control target key end

     0   :  { %8 = vsyncpa [#allocation3], 0  ;;  %s226_s0 = inlined_call_operand.hbm [shape: f32[8,32], index: 0, kind: input, shape index: {}]   ;;  %s227_s1 = inlined_call_operand.hbm [shape: f32[1,32], index: 1, kind: input, shape index: {}]   ;;  %s228_s2 = inlined_call_operand.vmem [shape: f32[1,32], index: 2, kind: input, shape index: {}]   ;;  %s229_s3 = inlined_call_operand.hbm [shape: f32[8,32], index: 3, kind: output, shape index: {}]  }
   0x1   :  { %9 = vsyncpa [#allocation6], 0 }
   0x2   :  { %10 = vsyncpa [#allocation4], 0  ;;  %s16_s14 = sshll.u32 %s226_s0, 4  ;;  %s188_s15 = smov [#allocation2]   ;;  %s17_s14 = int_to_ptr.hbm [resolvable:$true] %s16_s14 }
   0x3   :  { %s18_s16 = sshll.u32 %s188_s15, 4  ;;  %s27_s19 = sshll.u32 %s227_s1, 4  ;;  %s19_s16 = int_to_ptr.vmem [resolvable:$true] %s18_s16  ;;  %s28_s19 = int_to_ptr.hbm [resolvable:$true] %s27_s19 }
   0x4   :  { %21 = dma.hbm_to_vmem [thread:$0]  %s17_s14, 128, %s19_s16, [#allocation3]  }
   0x5   :  { %s189_s20 = smov [#allocation5]  }
   0x6   :  { %s29_s21 = sshll.u32 %s189_s20, 4  ;;  %s30_s21 = int_to_ptr.vmem [resolvable:$true] %s29_s21 }
   0x7   :  { %32 = dma.hbm_to_vmem [thread:$0]  %s28_s19, 16, %s30_s21, [#allocation6]  }
   0x8   :  { %182 = dma.done.wait [#allocation3], 128  }
   0x9   :  { %183 = vsyncadd [#allocation3], 4294967168 }
   0xa   :  { %184 = dma.done.wait [#allocation6], 16  }
   0xb   :  { %185 = vsyncadd [#allocation6], 4294967280  ;;  %vm44_vm0 = vcmask 261120   ;;  %v43_v0 = vld [vmem:[#allocation2] sm:$0xff]  ;;  %v74_v26 = vld [vmem:[#allocation5] sm:$0x1] }
   0xc   :  { %v45_v1 = vsel %vm44_vm0, %v43_v0, 0.0  ;;  %v76_v29 = vld [vmem:[%s228_s2] sm:$0x1]  ;;  %s190_s22 = smov [#allocation7]   ;;  %s94_s26 = sshll.u32 %s229_s3, 4  ;;  %s95_s26 = int_to_ptr.hbm [resolvable:$true] %s94_s26 }
   0xd   :  { %v46_v2 = vrot.slane %v45_v1, 4  ;;  %s92_s23 = sshll.u32 %s190_s22, 4  ;;  %s93_s23 = int_to_ptr.vmem [resolvable:$true] %s92_s23 }
   0xf   :  { %v47_v3 = vadd.f32 %v46_v2, %v45_v1 }
  0x11   :  { %v48_v4 = vrot.slane %v47_v3, 2 }
  0x13   :  { %v49_v5 = vadd.f32 %v48_v4, %v47_v3 }
  0x15   :  { %v50_v6 = vrot.slane %v49_v5, 1 }
  0x17   :  { %v51_v7 = vadd.f32 %v50_v6, %v49_v5 }
  0x19   :  { %v52_v8 = vmul.f32 0.125, %v51_v7 }
  0x1b   :  { %v53_v9 = vsub.f32 %v43_v0, %v52_v8 }
  0x1d   :  { %v54_v10 = vmul.f32 %v53_v9, %v53_v9 }
  0x1f   :  { %v55_v11 = vsel %vm44_vm0, %v54_v10, 0.0 }
  0x20   :  { %v56_v12 = vrot.slane %v55_v11, 4 }
  0x22   :  { %v57_v13 = vadd.f32 %v56_v12, %v55_v11 }
  0x24   :  { %v58_v14 = vrot.slane %v57_v13, 2 }
  0x26   :  { %v59_v15 = vadd.f32 %v58_v14, %v57_v13 }
  0x28   :  { %v60_v16 = vrot.slane %v59_v15, 1 }
  0x2a   :  { %v61_v17 = vadd.f32 %v60_v16, %v59_v15 }
  0x2c   :  { %v62_v18 = vmul.f32 0.125, %v61_v17 }
  0x2e   :  { %v63_v19 = vadd.f32 1e-05, %v62_v18 }
  0x30   :  { %108 = vrsqrt.f32 %v63_v19  ;;  %vm70_vm1 = vweird.f32 %v63_v19 }
  0x36   :  { %v109_v20 = vpop.eup %108 }
  0x37   :  { %v65_v21 = vmul.f32 %v109_v20, %v63_v19  ;;  %vm71_vm2 = vweird.f32 %v109_v20 }
  0x38   :  { %vm72_vm3 = vmor %vm70_vm1, %vm71_vm2 }
  0x39   :  { %v66_v22 = vmul.f32 %v109_v20, %v65_v21 }
  0x3b   :  { %v67_v23 = vmul.f32 0.5, %v66_v22 }
  0x3d   :  { %v68_v24 = vsub.f32 1.5, %v67_v23 }
  0x3f   :  { %v69_v25 = vmul.f32 %v109_v20, %v68_v24 }
  0x41   :  { %v73_v27 = vsel %vm72_vm3, %v109_v20, %v69_v25 }
  0x42   :  { %v75_v28 = vmul.f32 %v74_v26, %v73_v27 }
  0x44   :  { %v77_v30 = vmul.f32 %v75_v28, %v52_v8  ;;  %v79_v31 = vperm.slane %v75_v28, 0 }
  0x46   :  { %v78_v32 = vsub.f32 %v76_v29, %v77_v30  ;;  %v80_v33 = vmul.f32 %v79_v31, %v43_v0 }
  0x48   :  { %v82_v34 = vperm.slane %v78_v32, 0 }
  0x4a   :  { %v84_v35 = vadd.f32 %v82_v34, %v80_v33 }
  0x4c   :  { %v85_v36 = vmax.f32 %v84_v35, 0.0 }
  0x4e   :  { %86 = vst.msk [vmem:[#allocation7] sm:$0xff] %vm44_vm0, %v85_v36 }
  0x4f   :  { %97 = dma.vmem_to_hbm [thread:$0]  %s93_s23, 128, %s95_s26, [#allocation4]  }
  0x50   :  { %186 = dma.done.wait [#allocation4], 128  }
  0x51   :  { %187 = vsyncadd [#allocation4], 4294967168 }
  0x52   :  { %102 = vsyncpa [#allocation3], 1 }
  0x53   :  { %103 = vsyncpa [#allocation6], 1 }
  0x54   :  { %104 = vsyncpa [#allocation4], 1 }

</bundles_post_ra>
